<compile_context>
chip_gen: v7x
topology: tpu7x:2x2x1
jax: 0.10.0
libtpu: 0.0.40
codegen_flags: <defaults>
</compile_context>

<pallas_src>
import functools

import jax
import jax.numpy as jnp
from jax.experimental import pallas as pl
from jax.experimental.pallas import tpu as pltpu

LANE = 128
VMEM_BUDGET = 40 * 1024 * 1024   # working-set target: fits v7x's 64 MiB physical VMEM per TC
VMEM_LIMIT = 48 * 1024 * 1024    # scoped-VMEM limit handed to Mosaic (defaults are 16/32 MiB)


# ----------------------------------------------------------------------------
# Stage 1: parallel input projection  gx = x_tm @ Wi_fused + b_fused   (bf16 in/out, f32 acc)
# ----------------------------------------------------------------------------
def _input_proj_kernel(x_ref, wi_ref, bi_ref, gx_ref):
    acc = jnp.dot(x_ref[...], wi_ref[...], preferred_element_type=jnp.float32)
    gx_ref[...] = (acc + bi_ref[...]).astype(gx_ref.dtype)


# ----------------------------------------------------------------------------
# Stage 2: sequential recurrence. One grid step processes `chunk_t` time steps.
# gx is a dense 2-D time-major slab (rows = t*B + b), so per-step reads are
# static, sublane-dense slices even for tiny batch sizes.
# ----------------------------------------------------------------------------
def _gru_recurrent_kernel(gx_ref, wh_ref, bhn_ref, h_ref, *, seq_len, chunk_t, batch):
    c = pl.program_id(0)

    @pl.when(c == 0)
    def _():
        h_ref[...] = jnp.zeros_like(h_ref)

    hp = h_ref.shape[-1]
    wh = wh_ref[...]                                        # (Hp, 3Hp) bf16, hoisted
    bhn = jnp.broadcast_to(bhn_ref[...], (batch, hp))       # hoisted broadcast (f32)

    h = h_ref[...]                                          # (B, Hp) f32 carry
    for j in range(chunk_t):                                # static unroll -> static slices
        gx = gx_ref[j * batch:(j + 1) * batch, :]           # (B, 3Hp) bf16
        # Single fused matmul per step: (B, Hp) @ (Hp, 3Hp), bf16 operands, f32 accumulate.
        gh = jnp.dot(h.astype(jnp.bfloat16), wh, preferred_element_type=jnp.float32)

        # PyTorch GRU gate order (r, z, n). b_i (+ folded b_hr/b_hz) already live in gx.
        r = jax.nn.sigmoid(gx[:, 0 * hp:1 * hp] + gh[:, 0 * hp:1 * hp])
        z = jax.nn.sigmoid(gx[:, 1 * hp:2 * hp] + gh[:, 1 * hp:2 * hp])
        n = jnp.tanh(gx[:, 2 * hp:3 * hp] + r * (gh[:, 2 * hp:3 * hp] + bhn))
        h_new = (1.0 - z) * n + z * h

        if seq_len % chunk_t != 0:
            # Tail mask; only traced when T does not divide S (we try hard to avoid that).
            t = c * chunk_t + j
            h_new = jnp.where(t < seq_len, h_new, h)
        h = h_new

    h_ref[...] = h


# ----------------------------------------------------------------------------
# Tile-size selection from an explicit VMEM budget
# ----------------------------------------------------------------------------
def _pick_time_chunk(S, B, G3, Hp, budget):
    """Time steps per stage-2 grid iteration."""
    fixed = 2 * Hp * G3 + 2 * 4 * B * Hp              # wh (bf16, 1 buffer) + h (f32, 2 buffers)
    per_t = 2 * (2 * B * G3)                          # double-buffered bf16 gx rows per step
    t_max = (budget - fixed) // per_t if budget > fixed else 1
    t_max = int(max(1, min(t_max, 16, S)))            # >16 steps/chunk: diminishing returns
    # Prefer divisors of S (statically dead tail mask) with sublane-aligned row blocks.
    for t in range(t_max, 0, -1):
        if S % t == 0 and ((t * B) % 8 == 0 or t == S):
            return t
    # Otherwise: aligned row blocks, keep the tail mask.
    for t in range(t_max, 0, -1):
        if (t * B) % 8 == 0:
            return t
    return S                                          # degenerate tiny-B fallback: full sequence


def _pick_n_tile(G3, Din, budget):
    """Lane (output) tile for stage 1: multiple of 128 dividing 3*Hp."""
    for tn in range(G3, 127, -128):
        if G3 % tn == 0 and 2 * (2 * Din * tn) <= budget // 2:
            return tn
    return 128


def _pick_row_tile(R, Din, TN, budget):
    """Row tile for stage 1 (multiple of 8)."""
    wi_bytes = 2 * (2 * Din * TN)                     # bf16 weight block, worst-case 2 buffers
    per_row = 2 * 2 * (Din + TN)                      # double-buffered bf16 x row + gx row
    tm = (budget - wi_bytes) // per_row if budget > wi_bytes else 8
    tm = max(8, min(tm, 1024, ((R + 7) // 8) * 8))
    return (tm // 8) * 8


# ----------------------------------------------------------------------------
# Wrapper
# ----------------------------------------------------------------------------
def rrgru_forward(x, packed):
    """x: (batch, seq_len, input_size) f32 -> (batch, hidden_size) f32."""
    B, S, Din = x.shape
    H, Hp = packed["H"], packed["Hp"]
    G3 = 3 * Hp
    wi, wh, bi, bhn = packed["wi"], packed["wh"], packed["bi"], packed["bhn"]

    # -------- stage-2 time chunking (decided first; stage 1 emits a matching slab) --------
    T = _pick_time_chunk(S, B, G3, Hp, VMEM_BUDGET)
    nchunks = pl.cdiv(S, T)
    Sp = nchunks * T
    R = Sp * B                                        # rows of the time-major gx slab

    # Time-major flattened bf16 view of x (single cheap pass over the *small* x array; the
    # big gx slab itself is produced pre-shaped / pre-padded by stage 1 -> no wrapper pass).
    x_tm = jnp.transpose(x, (1, 0, 2)).reshape(S * B, Din).astype(jnp.bfloat16)

    if (T * B) % 8 != 0:
        # Degenerate tiny-batch fallback (T == S): single full-height blocks everywhere.
        TM, num_m, Rp = R, 1, R
    else:
        TN_probe = _pick_n_tile(G3, Din, VMEM_BUDGET)
        TM = _pick_row_tile(R, Din, TN_probe, VMEM_BUDGET)
        num_m = pl.cdiv(R, TM)
        Rp = num_m * TM
    TN = _pick_n_tile(G3, Din, VMEM_BUDGET) if (T * B) % 8 == 0 else G3
    num_n = G3 // TN

    if Rp != S * B:
        x_tm = jnp.pad(x_tm, ((0, Rp - S * B), (0, 0)))

    # ---------------- Stage 1: hoisted parallel projection ----------------
    if num_n == 1:  # constant-index weight/bias blocks -> single-buffer them
        wi_spec = pl.BlockSpec((Din, TN), lambda i, j: (0, j), pipeline_mode=pl.Buffered(1))
        bi_spec = pl.BlockSpec((1, TN), lambda i, j: (0, j), pipeline_mode=pl.Buffered(1))
    else:
        wi_spec = pl.BlockSpec((Din, TN), lambda i, j: (0, j))
        bi_spec = pl.BlockSpec((1, TN), lambda i, j: (0, j))
    # TODO(synk): for very large Din add a K ("arbitrary") grid axis with an f32 VMEM accumulator.

    gx = pl.pallas_call(
        _input_proj_kernel,
        out_shape=jax.ShapeDtypeStruct((Rp, G3), jnp.bfloat16),
        grid_spec=pltpu.PrefetchScalarGridSpec(
            num_scalar_prefetch=0,
            grid=(num_m, num_n),
            in_specs=[
                pl.BlockSpec((TM, Din), lambda i, j: (i, 0)),
                wi_spec,
                bi_spec,
            ],
            out_specs=pl.BlockSpec((TM, TN), lambda i, j: (i, j)),
        ),
        compiler_params=pltpu.CompilerParams(
            dimension_semantics=("parallel", "parallel"),
            vmem_limit_bytes=VMEM_LIMIT),
    )(x_tm, wi, bi)

    # ---------------- Stage 2: sequential recurrence ----------------
    # TODO(synk): on v7x with large B, add a leading "parallel" batch-block grid axis
    # (grid=(B//TB, nchunks)) so both TensorCores share the recurrence.
    kernel = functools.partial(_gru_recurrent_kernel, seq_len=S, chunk_t=T, batch=B)
    h = pl.pallas_call(
        kernel,
        out_shape=jax.ShapeDtypeStruct((B, Hp), jnp.float32),
        grid_spec=pltpu.PrefetchScalarGridSpec(
            num_scalar_prefetch=0,
            grid=(nchunks,),
            in_specs=[
                pl.BlockSpec((T * B, G3), lambda c: (c, 0)),
                pl.BlockSpec((Hp, G3), lambda c: (0, 0), pipeline_mode=pl.Buffered(1)),
                pl.BlockSpec((1, Hp), lambda c: (0, 0), pipeline_mode=pl.Buffered(1)),
            ],
            out_specs=pl.BlockSpec((B, Hp), lambda c: (0, 0)),
        ),
        compiler_params=pltpu.CompilerParams(
            dimension_semantics=("arbitrary",),       # true recurrence over time
            vmem_limit_bytes=VMEM_LIMIT),
    )(gx, wh, bhn)

    return h[:, :H]


# ----------------------------------------------------------------------------
# Parameter init (nn.GRU layout) and packing (fused, bf16, lane-padded, biases folded)
# ----------------------------------------------------------------------------
def init_gru_params(key, input_size, hidden_size):
    """Raw params with nn.GRU shapes, U(-1/sqrt(H), 1/sqrt(H))."""
    k = 1.0 / jnp.sqrt(hidden_size)
    keys = jax.random.split(key, 4)
    return {
        "w_ih": jax.random.uniform(keys[0], (3 * hidden_size, input_size), jnp.float32, -k, k),
        "w_hh": jax.random.uniform(keys[1], (3 * hidden_size, hidden_size), jnp.float32, -k, k),
        "b_ih": jax.random.uniform(keys[2], (3 * hidden_size,), jnp.float32, -k, k),
        "b_hh": jax.random.uniform(keys[3], (3 * hidden_size,), jnp.float32, -k, k),
    }


def pack_gru_params(raw, lane=LANE):
    """Fuse per-gate weights, zero-pad H -> Hp (128 lanes), store weights in bf16,
    and fold b_hr/b_hz into the input-side bias (only b_hn must stay separate)."""
    w_ih, w_hh, b_ih, b_hh = raw["w_ih"], raw["w_hh"], raw["b_ih"], raw["b_hh"]
    H = w_hh.shape[1]
    Din = w_ih.shape[1]
    Hp = ((H + lane - 1) // lane) * lane
    G3 = 3 * Hp

    wi = jnp.zeros((Din, G3), jnp.float32)
    wh = jnp.zeros((Hp, G3), jnp.float32)
    bi = jnp.zeros((1, G3), jnp.float32)
    bhn = jnp.zeros((1, Hp), jnp.float32)
    for g in range(3):                                # gate order r, z, n
        wi = wi.at[:, g * Hp:g * Hp + H].set(w_ih[g * H:(g + 1) * H, :].T)
        wh = wh.at[:H, g * Hp:g * Hp + H].set(w_hh[g * H:(g + 1) * H, :].T)
        b = b_ih[g * H:(g + 1) * H]
        if g < 2:                                     # fold b_hr / b_hz into the r / z bias
            b = b + b_hh[g * H:(g + 1) * H]
        bi = bi.at[0, g * Hp:g * Hp + H].set(b)
    bhn = bhn.at[0, :H].set(b_hh[2 * H:3 * H])

    return {"wi": wi.astype(jnp.bfloat16), "wh": wh.astype(jnp.bfloat16),
            "bi": bi, "bhn": bhn, "H": H, "Hp": Hp}


# ----------------------------------------------------------------------------
# Pure-JAX fp32 reference (same math as torch.nn.GRU forward, h0 = 0)
# ----------------------------------------------------------------------------
def rrgru_reference(x, raw):
    w_ih, w_hh, b_ih, b_hh = raw["w_ih"], raw["w_hh"], raw["b_ih"], raw["b_hh"]
    H = w_hh.shape[1]
    B = x.shape[0]
    h0 = jnp.zeros((B, H), jnp.float32)

    w_ir, w_iz, w_in = w_ih[:H], w_ih[H:2 * H], w_ih[2 * H:]
    w_hr, w_hz, w_hn = w_hh[:H], w_hh[H:2 * H], w_hh[2 * H:]
    b_ir, b_iz, b_in = b_ih[:H], b_ih[H:2 * H], b_ih[2 * H:]
    b_hr, b_hz, b_hn = b_hh[:H], b_hh[H:2 * H], b_hh[2 * H:]

    def step(h, x_t):
        r = jax.nn.sigmoid(x_t @ w_ir.T + b_ir + h @ w_hr.T + b_hr)
        z = jax.nn.sigmoid(x_t @ w_iz.T + b_iz + h @ w_hz.T + b_hz)
        n = jnp.tanh(x_t @ w_in.T + b_in + r * (h @ w_hn.T + b_hn))
        return (1.0 - z) * n + z * h, None

    h_last, _ = jax.lax.scan(step, h0, jnp.transpose(x, (1, 0, 2)))
    return h_last


if __name__ == "__main__":
    batch, seq_len, input_size, hidden_size = 2, 8, 32, 32

    key = jax.random.PRNGKey(0)
    kx, kp = jax.random.split(key)
    x = jax.random.normal(kx, (batch, seq_len, input_size), jnp.float32)
    raw = init_gru_params(kp, input_size, hidden_size)
    packed = pack_gru_params(raw)

    h_last = jax.block_until_ready(rrgru_forward(x, packed))
    h_ref = jax.block_until_ready(rrgru_reference(x, raw))

    assert h_last.shape == (batch, hidden_size)
    # bf16 weights / bf16 gx vs fp32 reference -> loosened tolerance.
    assert jnp.allclose(h_last, h_ref, atol=3e-2, rtol=3e-2), "Pallas GRU mismatch vs reference"
    print("KERNEL_OK")
</pallas_src>

<mosaic_0001>
module attributes {stable_mosaic.version = 11 : i64} {
  func.func @_input_proj_kernel(%arg0: i32, %arg1: i32, %arg2: memref<16x32xbf16, #tpu.memory_space<vmem>>, %arg3: memref<32x384xbf16, #tpu.memory_space<vmem>>, %arg4: memref<1x384xf32, #tpu.memory_space<vmem>>, %arg5: memref<16x384xbf16, #tpu.memory_space<vmem>>) attributes {dimension_semantics = [#tpu.dimension_semantics<parallel>, #tpu.dimension_semantics<parallel>], iteration_bounds = array<i64: 1, 1>, scalar_prefetch = 0 : i64, scratch_operands = 0 : i64, tpu.core_type = #tpu.core_type<tc>, window_params = [{transform_indices = @transform_0, window_bounds = array<i64: 16, 32>}, {pipeline_mode = #tpu.pipeline_mode<synchronous>, transform_indices = @transform_1, window_bounds = array<i64: 32, 384>}, {pipeline_mode = #tpu.pipeline_mode<synchronous>, transform_indices = @transform_2, window_bounds = array<i64: 1, 384>}, {transform_indices = @transform_3, window_bounds = array<i64: 16, 384>}]} {
    %c0 = arith.constant 0 : index
    %c0_0 = arith.constant 0 : index
    %0 = vector.load %arg2[%c0, %c0_0] : memref<16x32xbf16, #tpu.memory_space<vmem>>, vector<16x32xbf16>
    %c0_1 = arith.constant 0 : index
    %c0_2 = arith.constant 0 : index
    %1 = vector.load %arg3[%c0_1, %c0_2] : memref<32x384xbf16, #tpu.memory_space<vmem>>, vector<32x384xbf16>
    %cst = arith.constant dense<0.000000e+00> : vector<16x384xf32>
    %2 = tpu.matmul %0, %1, %cst {dimension_numbers = #tpu.dot_dimension_numbers<[1], [0], [0], [1], [0, 0, 1, 1], [], []>} : vector<16x32xbf16>, vector<32x384xbf16>, vector<16x384xf32> -> vector<16x384xf32>
    %c0_3 = arith.constant 0 : index
    %c0_4 = arith.constant 0 : index
    %3 = vector.load %arg4[%c0_3, %c0_4] : memref<1x384xf32, #tpu.memory_space<vmem>>, vector<1x384xf32>
    %4 = vector.broadcast %3 : vector<1x384xf32> to vector<16x384xf32>
    %5 = arith.addf %2, %4 : vector<16x384xf32>
    %6 = arith.truncf %5 : vector<16x384xf32> to vector<16x384xbf16>
    %c0_5 = arith.constant 0 : index
    %c0_6 = arith.constant 0 : index
    %7 = vector.load %arg5[%c0_5, %c0_6] : memref<16x384xbf16, #tpu.memory_space<vmem>>, vector<16x384xbf16>
    tpu.vector_store %arg5[%c0_5, %c0_6], %6 {strides = array<i32>} : memref<16x384xbf16, #tpu.memory_space<vmem>>, vector<16x384xbf16>,
    return
  }
  func.func @transform_0(%arg0: i32, %arg1: i32) -> (i32, i32) {
    %c0_i32 = arith.constant 0 : i32
    %c0_i32_0 = arith.constant 0 : i32
    return %arg0, %c0_i32 : i32, i32
  }
  func.func @transform_1(%arg0: i32, %arg1: i32) -> (i32, i32) {
    %c0_i32 = arith.constant 0 : i32
    %c0_i32_0 = arith.constant 0 : i32
    return %c0_i32, %arg1 : i32, i32
  }
  func.func @transform_2(%arg0: i32, %arg1: i32) -> (i32, i32) {
    %c0_i32 = arith.constant 0 : i32
    %c0_i32_0 = arith.constant 0 : i32
    return %c0_i32, %arg1 : i32, i32
  }
  func.func @transform_3(%arg0: i32, %arg1: i32) -> (i32, i32) {
    %c0_i32 = arith.constant 0 : i32
    return %arg0, %arg1 : i32, i32
  }
}

</mosaic_0001>

<bundles_post_ra>
// kernel: tpu_custom_call.1
= control target key start
LH: loop header
LB: loop body
LE: loop exit
PB: predicated region body
PF: predicated region fallthrough
CT: control target
= control target key end

     0   :  { %8 = vsyncpa [#allocation3], 0  ;;  %s432_s0 = inlined_call_operand.hbm [shape: bf16[16,32], index: 0, kind: input, shape index: {}]   ;;  %s433_s1 = inlined_call_operand.hbm [shape: bf16[32,384], index: 1, kind: input, shape index: {}]   ;;  %s434_s2 = inlined_call_operand.vmem [shape: f32[1,384], index: 2, kind: input, shape index: {}]   ;;  %s435_s3 = inlined_call_operand.hbm [shape: bf16[16,384], index: 3, kind: output, shape index: {}]  }
   0x1   :  { %9 = vsyncpa [#allocation6], 0 }
   0x2   :  { %10 = vsyncpa [#allocation4], 0  ;;  %s357_s12 = smov [#allocation2]   ;;  %s285_s16 = scalar_lea.hbm %s432_s0, 128 }
   0x3   :  { %s16_s13 = sshll.u32 %s357_s12, 4  ;;  %p286_p0 = scmp.ne.s32.totalorder %s432_s0, %s285_s16  ;;  %s17_s13 = int_to_ptr.vmem [resolvable:$true] %s16_s13 }
   0x4   :  { %p289_p1 = scmp.lt.u32.totalorder %s285_s16, %s432_s0 }
   0x6   :  { %p291_p2 = pnand %p289_p1, %p286_p0 }
   0x8   :  { %294 = shalt.err (!%p291_p2)
}
   0x9   :  { %s295_s21 = scalar_lea.vmem %s17_s13, 128  ;;  %p300_p4 = scmp.lt.s32.totalorder %s17_s13, %s17_s13 }
   0xa   :  { %p296_p3 = scmp.ne.s32.totalorder %s17_s13, %s295_s21  ;;  %p301_p5 = scmp.lt.s32.totalorder %s295_s21, %s295_s21 }
   0xc   :  { %p302_p6 = por %p301_p5, %p300_p4 }
   0xe   :  { %p303_p7 = pnand %p302_p6, %p296_p3 }
  0x10   :  { %306 = shalt.err (!%p303_p7)
}
  0x11   :  { %s358_s22 = smov 64   ;;  %s359_s23 = smov 4  }
  0x12   :  { %22 = dma.hbm_to_vmem [thread:$0]  %s432_s0, 128, %s17_s13, [#allocation3], %s358_s22, %s358_s22, %s359_s23  }
  0x13   :  { %s360_s26 = smov [#allocation5]   ;;  %s307_s30 = scalar_lea.hbm %s433_s1, 768 }
  0x14   :  { %s28_s27 = sshll.u32 %s360_s26, 4  ;;  %p308_p8 = scmp.ne.s32.totalorder %s433_s1, %s307_s30  ;;  %s29_s27 = int_to_ptr.vmem [resolvable:$true] %s28_s27 }
  0x15   :  { %p311_p9 = scmp.lt.u32.totalorder %s307_s30, %s433_s1 }
  0x17   :  { %p313_p10 = pnand %p311_p9, %p308_p8 }
  0x19   :  { %316 = shalt.err (!%p313_p10)
}
  0x1a   :  { %s317_s8 = scalar_lea.vmem %s29_s27, 768  ;;  %p322_p12 = scmp.lt.s32.totalorder %s29_s27, %s29_s27 }
  0x1b   :  { %p318_p11 = scmp.ne.s32.totalorder %s29_s27, %s317_s8  ;;  %p323_p13 = scmp.lt.s32.totalorder %s317_s8, %s317_s8 }
  0x1d   :  { %p324_p0 = por %p323_p13, %p322_p12 }
  0x1f   :  { %p325_p1 = pnand %p324_p0, %p318_p11 }
  0x21   :  { %328 = shalt.err (!%p325_p1)
}
  0x22   :  { %s361_s0 = smov 192   ;;  %s362_s9 = smov 12  }
  0x23   :  { %34 = dma.hbm_to_vmem [thread:$0]  %s433_s1, 768, %s29_s27, [#allocation6], %s361_s0, %s361_s0, %s362_s9  }
  0x24   :  { %351 = dma.done.wait [#allocation3], 128  }
  0x25   :  { %352 = vsyncadd [#allocation3], 4294967168 }
  0x26   :  { %353 = dma.done.wait [#allocation6], 768  }
  0x27   :  { %354 = vsyncadd [#allocation6], 4294966528  ;;  %v363_v0 = vmov 0.0   ;;  %vm364_vm0 = vmmov 0   ;;  %v365_v1 = vmov 0   ;;  %v284_v8 = vld [vmem:[#allocation2] sm:$0xff]   ;;  %v56_v9 = vlaneseq }
  0x28   :  { %258 = vmatprep.subr.bf16.mxu1 %v363_v0  ;;  %262 = vmatprep.mubr.msk.bf16.mxu1 %vm364_vm0, %v363_v0  ;;  %v276_v2 = vld [vmem:[#allocation5 + $0x4] ss:$12 sps:$4 sm:$0xff]   ;;  %v278_v3 = vld [vmem:[#allocation5 + $0x8] ss:$12 sps:$4 sm:$0xff]   ;;  %v279_v4 = vld [vmem:[#allocation5] ss:$12 sps:$4 sm:$0xff]  }
  0x29   :  { %144 = vmatprep.mubr.bf16.mxu0 %v365_v1  ;;  %112 = vmatprep.subr.bf16.mxu0 %v276_v2  ;;  %v280_v5 = vld [vmem:[#allocation5 + $0x1c] ss:$12 sps:$4 sm:$0xff]   ;;  %v282_v6 = vld [vmem:[#allocation5 + $0x20] ss:$12 sps:$4 sm:$0xff]   ;;  %v283_v7 = vld [vmem:[#allocation5 + $0x18] ss:$12 sps:$4 sm:$0xff]  }
  0x2a   :  { %259 = vmatpush3.bf16.msra.mxu1 %v278_v3  ;;  %113 = vmatpush1.bf16.msra.mxu0 %v279_v4  ;;  %vm108_vm1 = vcmask 261120   ;;  %v57_v10 = vshrl.u32 %v56_v9, 7  ;;  %v54_v12 = vld [vmem:[%s434_s2] sm:$0x7]  ;;  %s366_s2 = smov [#allocation7]  }
  0x2b   :  { %260 = vmatprep.subr.bf16.mxu1 %v363_v0  ;;  %114 = vmatprep.subr.bf16.mxu0 %v280_v5  ;;  %s225_s13 = sshll.u32 %s366_s2, 4  ;;  %s226_s13 = int_to_ptr.vmem [resolvable:$true] %s225_s13 }
  0x2c   :  { %v66_v11 = vsub.s32 2, %v57_v10  ;;  %v58_v13 = vsub.s32 0, %v57_v10  ;;  %v62_v14 = vsub.s32 1, %v57_v10  ;;  %s329_s14 = scalar_lea.vmem %s226_s13, 384  ;;  %p334_p3 = scmp.lt.s32.totalorder %s226_s13, %s226_s13 }
  0x2d   :  { %p330_p2 = scmp.ne.s32.totalorder %s226_s13, %s329_s14  ;;  %p335_p4 = scmp.lt.s32.totalorder %s329_s14, %s329_s14 }
  0x2e   :  { %261 = vmatpush3.bf16.msra.mxu1 %v282_v6  ;;  %115 = vmatpush1.bf16.msra.mxu0 %v283_v7  ;;  %v67_v15 = vrot.slane %v54_v12, %v66_v11  ;;  %v59_v16 = vrot.slane %v54_v12, %v58_v13  ;;  %v63_v17 = vrot.slane %v54_v12, %v62_v14 }
  0x2f   :  { %p336_p5 = por %p335_p4, %p334_p3 }
  0x31   :  { %263 = vmatmul.mubr.msk.bf16.vlgmr.msra.gmra.mrb[0].mxu1 %vm108_vm1, %v284_v8  ;;  %245 = vmatmul.mubr.msk.bf16.vlgmr.msra.gmra.mrb[0].mxu0 %vm108_vm1, %v284_v8  ;;  %p337_p6 = pnand %p336_p5, %p330_p2 }
 0x104   :  { %v189_v18 = vpop.f32.mrb[0].mxu1  ;;  %v146_v20 = vpop.f32.mrb[0].mxu0 }
 0x105   :  { %v190_v19 = vadd.f32 %v189_v18, %v67_v15  ;;  %v264_v21 = vpop.f32.mrb[1].mxu1  ;;  %v147_v22 = vadd.f32 %v146_v20, %v59_v16  ;;  %v148_v23 = vpop.f32.mrb[1].mxu0 }
 0x106   :  { %v192_v24 = vpop.f32.mrb[2].mxu1  ;;  %v149_v26 = vadd.f32 %v148_v23, %v63_v17  ;;  %v150_v28 = vpop.f32.mrb[2].mxu0 }
 0x107   :  { %v252_v25 = vpack.c.bf16 %v190_v19, %v190_v19  ;;  %v193_v27 = vadd.f32 %v192_v24, %v67_v15  ;;  %v265_v29 = vpop.f32.mrb[3].mxu1  ;;  %v151_v30 = vadd.f32 %v150_v28, %v59_v16  ;;  %v152_v31 = vpop.f32.mrb[3].mxu0 }
 0x108   :  { %v251_v32 = vpack.c.bf16 %v149_v26, %v147_v22  ;;  %v153_v34 = vadd.f32 %v152_v31, %v63_v17 }
 0x109   :  { %217 = vst [vmem:[#allocation7 + $0x8] sm:$0xf] %v252_v25  ;;  %v254_v33 = vpack.c.bf16 %v193_v27, %v193_v27 }
 0x10a   :  { %216 = vst [vmem:[#allocation7] sm:$0xff] %v251_v32  ;;  %v253_v35 = vpack.c.bf16 %v153_v34, %v151_v30 }
 0x10b   :  { %219 = vst [vmem:[#allocation7 + $0x14] sm:$0xf] %v254_v33 }
 0x10c   :  { %218 = vst [vmem:[#allocation7 + $0xc] sm:$0xff] %v253_v35 }
 0x10d   :  { %340 = shalt.err (!%p337_p6)
}
 0x10e   :  { %s341_s17 = scalar_lea.hbm %s435_s3, 384 }
 0x10f   :  { %p342_p7 = scmp.ne.s32.totalorder %s435_s3, %s341_s17  ;;  %p345_p8 = scmp.lt.u32.totalorder %s341_s17, %s435_s3 }
 0x111   :  { %p347_p9 = pnand %p345_p8, %p342_p7 }
 0x113   :  { %350 = shalt.err (!%p347_p9)
}
 0x114   :  { %231 = dma.vmem_to_hbm [thread:$0]  %s226_s13, 384, %s435_s3, [#allocation4], %s361_s0, %s361_s0, %s362_s9  }
 0x115   :  { %355 = dma.done.wait [#allocation4], 384  }
 0x116   :  { %356 = vsyncadd [#allocation4], 4294966912 }
 0x117   :  { %235 = vsyncpa [#allocation3], 1 }
 0x118   :  { %236 = vsyncpa [#allocation6], 1 }
 0x119   :  { %237 = vsyncpa [#allocation4], 1 }

</bundles_post_ra>
